<compile_context>
chip_gen: v6e
topology: v6e:2x2x1
jax: 0.10.0
libtpu: 0.0.40
codegen_flags: <defaults>
</compile_context>

<pallas_src>
import math

import jax
import jax.numpy as jnp
from jax.experimental import pallas as pl
from jax.experimental.pallas import tpu as pltpu


def _round_up(x, mult):
    return ((x + mult - 1) // mult) * mult


def _calculate_gain(nonlinearity):
    # Mirrors torch.nn.init.calculate_gain for the gains LinearNorm may use.
    if nonlinearity in ("linear", "sigmoid", "conv1d", "conv2d", "conv3d"):
        return 1.0
    if nonlinearity == "tanh":
        return 5.0 / 3.0
    if nonlinearity == "relu":
        return math.sqrt(2.0)
    if nonlinearity == "leaky_relu":
        return math.sqrt(2.0 / (1.0 + 0.01 ** 2))
    return 1.0


# ---------------------------------------------------------------------------
# Kernels
# ---------------------------------------------------------------------------
def _linear_kernel_single_k(x_ref, w_ref, b_ref, o_ref):
    # x_ref: (tm, K), w_ref: (K, tn), b_ref: (1, tn), o_ref: (tm, tn)
    acc = jnp.dot(x_ref[...], w_ref[...], preferred_element_type=jnp.float32)
    o_ref[...] = (acc + b_ref[...].astype(jnp.float32)).astype(o_ref.dtype)


def _linear_kernel_multi_k(x_ref, w_ref, b_ref, o_ref, acc_ref):
    # x_ref: (tm, tk), w_ref: (tk, tn), b_ref: (1, tn), o_ref: (tm, tn)
    k = pl.program_id(2)

    @pl.when(k == 0)
    def _():
        acc_ref[...] = jnp.zeros_like(acc_ref)

    acc_ref[...] += jnp.dot(x_ref[...], w_ref[...],
                            preferred_element_type=jnp.float32)

    @pl.when(k == pl.num_programs(2) - 1)
    def _():
        o_ref[...] = (acc_ref[...] + b_ref[...].astype(jnp.float32)).astype(o_ref.dtype)


# ---------------------------------------------------------------------------
# Tile selection
# ---------------------------------------------------------------------------
_VMEM_BUDGET = 48 << 20  # keep headroom on v7x's 64 MiB physical VMEM


def _select_tn_tk(out_dim, in_dim, mxu_itemsize, *, tm_budget=512,
                  vmem_budget=_VMEM_BUDGET):
    np0 = _round_up(out_dim, 128)
    kp0 = _round_up(in_dim, 128)

    # Largest tn in {512, 256, 128} that divides the 128-aligned N
    # (no padding waste beyond lane alignment).
    tn = 128
    for cand in (512, 256):
        if cand <= np0 and np0 % cand == 0:
            tn = cand
            break

    # Double-buffered working set (output/acc kept f32-conservative).
    def footprint(tk):
        return (2 * tm_budget * tk * mxu_itemsize      # x buffers
                + 2 * tk * tn * mxu_itemsize           # weight buffers
                + 2 * tm_budget * tn * 4               # output buffers
                + tm_budget * tn * 4)                  # accumulator scratch

    if footprint(kp0) <= vmem_budget:
        tk = kp0                                       # single K step
    else:
        tk = 128
        for cand in (4096, 2048, 1024, 512, 256):
            if cand < kp0 and footprint(cand) <= vmem_budget:
                tk = cand
                break
    return tn, tk


def _pick_tile_m(m):
    mp8 = _round_up(m, 8)
    if mp8 <= 128:
        return mp8
    # Minimize padded M; tie-break to the larger tile (higher intensity).
    return min((512, 256, 128), key=lambda t: (_round_up(m, t), -t))


# ---------------------------------------------------------------------------
# Forward with pre-packed parameters
# ---------------------------------------------------------------------------
def linear_norm_forward_packed(x, w_packed, b_packed, out_dim, *, tn, tk,
                               compute_dtype=None):
    """y = x @ W^T + b (torch.nn.Linear semantics).

    w_packed: (kp, np_) — weight.T, zero-padded to tile multiples (K, N layout).
    b_packed: (1, np_)  — bias, zero-padded, float32.
    """
    kp, np_ = w_packed.shape
    lead_shape = x.shape[:-1]
    in_dim = x.shape[-1]
    out_dtype = x.dtype
    m = int(math.prod(lead_shape)) if lead_shape else 1
    x2d = x.reshape(m, in_dim)
    if compute_dtype is not None and x2d.dtype != compute_dtype:
        x2d = x2d.astype(compute_dtype)

    tm = _pick_tile_m(m)
    # v7x has 2 TensorCores; if N has a single tile, split M so the parallel
    # grid has >= 2 steps (when the problem is big enough to split).
    if np_ // tn == 1:
        while tm >= 256 and _round_up(m, tm) // tm == 1 and m > tm // 2:
            tm //= 2
    mp = _round_up(m, tm)

    # Only the activations are padded per call (zeros contribute nothing).
    if mp != m or kp != in_dim:
        x2d = jnp.pad(x2d, ((0, mp - m), (0, kp - in_dim)))

    i_steps, j_steps, k_steps = mp // tm, np_ // tn, kp // tk

    in_isz = jnp.dtype(x2d.dtype).itemsize
    w_isz = jnp.dtype(w_packed.dtype).itemsize
    out_isz = jnp.dtype(out_dtype).itemsize
    cost = pl.CostEstimate(
        flops=2 * mp * np_ * kp,
        transcendentals=0,
        bytes_accessed=(mp * kp * in_isz * j_steps      # x re-read per N tile
                        + kp * np_ * w_isz * i_steps    # w re-read per M tile
                        + mp * np_ * out_isz
                        + np_ * jnp.dtype(b_packed.dtype).itemsize),
    )

    vmem_need = (2 * tm * tk * in_isz + 2 * tk * tn * w_isz
                 + 2 * tn * jnp.dtype(b_packed.dtype).itemsize
                 + 2 * tm * tn * out_isz
                 + (tm * tn * 4 if k_steps > 1 else 0))
    vmem_limit = int(min(max(vmem_need + (4 << 20), 32 << 20), 56 << 20))

    if k_steps == 1:
        out2d = pl.pallas_call(
            _linear_kernel_single_k,
            out_shape=jax.ShapeDtypeStruct((mp, np_), out_dtype),
            grid=(i_steps, j_steps),
            in_specs=[
                pl.BlockSpec((tm, tk), lambda i, j: (i, 0)),   # x tile (M, K)
                pl.BlockSpec((tk, tn), lambda i, j: (0, j)),   # weight tile (K, N)
                pl.BlockSpec((1, tn), lambda i, j: (0, j)),    # bias tile
            ],
            out_specs=pl.BlockSpec((tm, tn), lambda i, j: (i, j)),
            compiler_params=pltpu.CompilerParams(
                dimension_semantics=("parallel", "parallel"),
                vmem_limit_bytes=vmem_limit,
            ),
            cost_estimate=cost,
        )(x2d, w_packed, b_packed)
    else:
        out2d = pl.pallas_call(
            _linear_kernel_multi_k,
            out_shape=jax.ShapeDtypeStruct((mp, np_), out_dtype),
            grid=(i_steps, j_steps, k_steps),
            in_specs=[
                pl.BlockSpec((tm, tk), lambda i, j, k: (i, k)),  # x tile (M, K)
                pl.BlockSpec((tk, tn), lambda i, j, k: (k, j)),  # weight tile (K, N)
                pl.BlockSpec((1, tn), lambda i, j, k: (0, j)),   # bias tile
            ],
            out_specs=pl.BlockSpec((tm, tn), lambda i, j, k: (i, j)),
            scratch_shapes=[pltpu.VMEM((tm, tn), jnp.float32)],
            compiler_params=pltpu.CompilerParams(
                dimension_semantics=("parallel", "parallel", "arbitrary"),
                vmem_limit_bytes=vmem_limit,
            ),
            cost_estimate=cost,
        )(x2d, w_packed, b_packed)

    if mp != m or np_ != out_dim:
        out2d = out2d[:m, :out_dim]
    return out2d.reshape(*lead_shape, out_dim)


# ---------------------------------------------------------------------------
# Module-equivalent wrapper
# ---------------------------------------------------------------------------
class LinearNorm:
    """Pallas-TPU port of the PyTorch LinearNorm module.

    Parameters are packed once at construction: transposed to (K, N), optionally
    cast to the MXU compute dtype (e.g. bf16), and zero-padded to tile multiples,
    so the per-call path only pads the activations.
    """

    def __init__(self, key, in_dim, out_dim, bias=True, w_init_gain="linear",
                 compute_dtype=None, param_dtype=jnp.float32):
        self.in_dim = in_dim
        self.out_dim = out_dim
        self.compute_dtype = compute_dtype

        gain = _calculate_gain(w_init_gain)
        std = gain * math.sqrt(2.0 / (in_dim + out_dim))  # xavier_normal_
        wkey, bkey = jax.random.split(key)
        weight = std * jax.random.normal(wkey, (out_dim, in_dim), dtype=param_dtype)
        if bias:
            bound = 1.0 / math.sqrt(in_dim)   # nn.Linear default bias init
            b = jax.random.uniform(bkey, (out_dim,), minval=-bound, maxval=bound,
                                   dtype=param_dtype)
        else:
            b = jnp.zeros((out_dim,), dtype=param_dtype)
        self.set_params(weight, b)

    def set_params(self, weight, bias):
        """(Re-)pack parameters: transpose to (K, N), cast, zero-pad to tiles."""
        self.weight = weight          # torch layout (out_dim, in_dim), reference
        self.bias = bias
        mxu_dtype = self.compute_dtype if self.compute_dtype is not None else weight.dtype
        isz = jnp.dtype(mxu_dtype).itemsize
        self.tn, self.tk = _select_tn_tk(self.out_dim, self.in_dim, isz)
        kp = _round_up(self.in_dim, self.tk)
        np_ = _round_up(self.out_dim, self.tn)
        w_kn = weight.T.astype(mxu_dtype)
        self.w_packed = jnp.pad(w_kn, ((0, kp - self.in_dim), (0, np_ - self.out_dim)))
        b2d = bias.reshape(1, self.out_dim).astype(jnp.float32)
        self.b_packed = jnp.pad(b2d, ((0, 0), (0, np_ - self.out_dim)))

    def __call__(self, x):
        return linear_norm_forward_packed(
            x, self.w_packed, self.b_packed, self.out_dim,
            tn=self.tn, tk=self.tk, compute_dtype=self.compute_dtype)


if __name__ == "__main__":
    key = jax.random.PRNGKey(0)
    kx, kparams = jax.random.split(key)

    batch, seq, in_dim, out_dim = 2, 8, 32, 32
    x = jax.random.normal(kx, (batch, seq, in_dim), dtype=jnp.float32)

    # f32 path — matches torch.nn.Linear semantics tightly.
    layer = LinearNorm(kparams, in_dim, out_dim)
    y = jax.block_until_ready(layer(x))
    ref = x @ layer.weight.T + layer.bias
    assert y.shape == (batch, seq, out_dim)
    assert jnp.allclose(y, ref, atol=1e-5, rtol=1e-5), float(jnp.max(jnp.abs(y - ref)))

    # bf16 MXU path (f32 accumulate + f32 bias add) — looser tolerance.
    layer_bf16 = LinearNorm(kparams, in_dim, out_dim, compute_dtype=jnp.bfloat16)
    y_bf16 = jax.block_until_ready(layer_bf16(x))
    assert y_bf16.shape == (batch, seq, out_dim)
    assert jnp.allclose(y_bf16, ref, atol=3e-2, rtol=3e-2)

    print("KERNEL_OK")
</pallas_src>

<mosaic_0001>
module attributes {stable_mosaic.version = 11 : i64} {
  func.func @_linear_kernel_single_k(%arg0: i32, %arg1: i32, %arg2: memref<16x128xf32, #tpu.memory_space<vmem>>, %arg3: memref<128x128xf32, #tpu.memory_space<vmem>>, %arg4: memref<1x128xf32, #tpu.memory_space<vmem>>, %arg5: memref<16x128xf32, #tpu.memory_space<vmem>>) attributes {dimension_semantics = [#tpu.dimension_semantics<parallel>, #tpu.dimension_semantics<parallel>], iteration_bounds = array<i64: 1, 1>, scalar_prefetch = 0 : i64, scratch_operands = 0 : i64, tpu.core_type = #tpu.core_type<tc>, window_params = [{transform_indices = @transform_0, window_bounds = array<i64: 16, 128>}, {transform_indices = @transform_1, window_bounds = array<i64: 128, 128>}, {transform_indices = @transform_2, window_bounds = array<i64: 1, 128>}, {transform_indices = @transform_3, window_bounds = array<i64: 16, 128>}]} {
    %c0 = arith.constant 0 : index
    %c0_0 = arith.constant 0 : index
    %0 = vector.load %arg2[%c0, %c0_0] : memref<16x128xf32, #tpu.memory_space<vmem>>, vector<16x128xf32>
    %c0_1 = arith.constant 0 : index
    %c0_2 = arith.constant 0 : index
    %1 = vector.load %arg3[%c0_1, %c0_2] : memref<128x128xf32, #tpu.memory_space<vmem>>, vector<128x128xf32>
    %cst = arith.constant dense<0.000000e+00> : vector<16x128xf32>
    %2 = tpu.matmul %0, %1, %cst {dimension_numbers = #tpu.dot_dimension_numbers<[1], [0], [0], [1], [0, 0, 1, 1], [], []>} : vector<16x128xf32>, vector<128x128xf32>, vector<16x128xf32> -> vector<16x128xf32>
    %c0_3 = arith.constant 0 : index
    %c0_4 = arith.constant 0 : index
    %3 = vector.load %arg4[%c0_3, %c0_4] : memref<1x128xf32, #tpu.memory_space<vmem>>, vector<1x128xf32>
    %4 = vector.broadcast %3 : vector<1x128xf32> to vector<16x128xf32>
    %5 = arith.addf %2, %4 : vector<16x128xf32>
    %c0_5 = arith.constant 0 : index
    %c0_6 = arith.constant 0 : index
    %6 = vector.load %arg5[%c0_5, %c0_6] : memref<16x128xf32, #tpu.memory_space<vmem>>, vector<16x128xf32>
    tpu.vector_store %arg5[%c0_5, %c0_6], %5 {strides = array<i32>} : memref<16x128xf32, #tpu.memory_space<vmem>>, vector<16x128xf32>,
    return
  }
  func.func @transform_0(%arg0: i32, %arg1: i32) -> (i32, i32) {
    %c0_i32 = arith.constant 0 : i32
    %c0_i32_0 = arith.constant 0 : i32
    return %arg0, %c0_i32 : i32, i32
  }
  func.func @transform_1(%arg0: i32, %arg1: i32) -> (i32, i32) {
    %c0_i32 = arith.constant 0 : i32
    %c0_i32_0 = arith.constant 0 : i32
    return %c0_i32, %arg1 : i32, i32
  }
  func.func @transform_2(%arg0: i32, %arg1: i32) -> (i32, i32) {
    %c0_i32 = arith.constant 0 : i32
    %c0_i32_0 = arith.constant 0 : i32
    return %c0_i32, %arg1 : i32, i32
  }
  func.func @transform_3(%arg0: i32, %arg1: i32) -> (i32, i32) {
    %c0_i32 = arith.constant 0 : i32
    return %arg0, %arg1 : i32, i32
  }
}

</mosaic_0001>

<bundles_post_ra>
// kernel: tpu_custom_call.1
= control target key start
LH: loop header
LB: loop body
LE: loop exit
PB: predicated region body
PF: predicated region fallthrough
CT: control target
= control target key end

     0   :  { %8 = vsyncpa [#allocation3], 0  ;;  %s334_s0 = inlined_call_operand.hbm [shape: f32[16,128], index: 0, kind: input, shape index: {}]   ;;  %s335_s1 = inlined_call_operand.hbm [shape: f32[128,128], index: 1, kind: input, shape index: {}]   ;;  %s336_s2 = inlined_call_operand.vmem [shape: f32[1,128], index: 2, kind: input, shape index: {}]   ;;  %s337_s3 = inlined_call_operand.hbm [shape: f32[16,128], index: 3, kind: output, shape index: {}]  }
   0x1   :  { %9 = vsyncpa [#allocation6], 0 }
   0x2   :  { %10 = vsyncpa [#allocation4], 0  ;;  %s288_s12 = smov [#allocation2]  }
   0x3   :  { %s16_s13 = sshll.u32 %s288_s12, 4  ;;  %s17_s13 = int_to_ptr.vmem [resolvable:$true] %s16_s13 }
   0x4   :  { %s230_s14 = scalar_lea.vmem %s17_s13, 256  ;;  %p235_p1 = scmp.lt.s32.totalorder %s17_s13, %s17_s13 }
   0x5   :  { %p231_p0 = scmp.ne.s32.totalorder %s17_s13, %s230_s14  ;;  %p236_p2 = scmp.lt.s32.totalorder %s230_s14, %s230_s14 }
   0x7   :  { %p237_p3 = por %p236_p2, %p235_p1 }
   0x9   :  { %p238_p4 = pnand %p237_p3, %p231_p0 }
   0xb   :  { %241 = shalt.err (!%p238_p4)
}
   0xc   :  { %s289_s15 = smov 128   ;;  %s290_s16 = smov 8  }
   0xd   :  { %22 = dma.hbm_to_vmem [thread:$0]  %s334_s0, 256, %s17_s13, [#allocation3], %s289_s15, %s289_s15, %s290_s16  }
   0xe   :  { %s291_s19 = smov [#allocation5]  }
   0xf   :  { %s28_s20 = sshll.u32 %s291_s19, 4  ;;  %s29_s20 = int_to_ptr.vmem [resolvable:$true] %s28_s20 }
  0x10   :  { %s250_s21 = scalar_lea.vmem %s29_s20, 2048  ;;  %p255_p6 = scmp.lt.s32.totalorder %s29_s20, %s29_s20 }
  0x11   :  { %p251_p5 = scmp.ne.s32.totalorder %s29_s20, %s250_s21  ;;  %p256_p7 = scmp.lt.s32.totalorder %s250_s21, %s250_s21 }
  0x13   :  { %p257_p8 = por %p256_p7, %p255_p6 }
  0x15   :  { %p258_p9 = pnand %p257_p8, %p251_p5 }
  0x17   :  { %261 = shalt.err (!%p258_p9)
}
  0x18   :  { %34 = dma.hbm_to_vmem [thread:$0]  %s335_s1, 2048, %s29_s20, [#allocation6], %s289_s15, %s289_s15, %s290_s16  }
  0x19   :  { %282 = dma.done.wait [#allocation3], 256  }
  0x1a   :  { %283 = vsyncadd [#allocation3], 4294967040 }
  0x1b   :  { %284 = dma.done.wait [#allocation6], 2048  }
  0x1c   :  { %285 = vsyncadd [#allocation6], 4294965248  ;;  %v60_v0 = vld [vmem:[#allocation5 + $0x78] sm:$0xff]  ;;  %v59_v1 = vld [vmem:[#allocation5 + $0x70] sm:$0xff]  ;;  %s292_s24 = smov [#allocation7]  }
  0x1d   :  { %182 = vmatprep.subr.mxu0 %v60_v0  ;;  %v58_v2 = vld [vmem:[#allocation5 + $0x68] sm:$0xff]  ;;  %v57_v3 = vld [vmem:[#allocation5 + $0x60] sm:$0xff]  ;;  %v43_v4 = vld [vmem:[#allocation2] sm:$0xff]  ;;  %s150_s25 = sshll.u32 %s292_s24, 4  ;;  %s151_s25 = int_to_ptr.vmem [resolvable:$true] %s150_s25 }
  0x1e   :  { %183 = vmatpush3.msra.mxu0 %v60_v0  ;;  %v56_v5 = vld [vmem:[#allocation5 + $0x58] sm:$0xff]  ;;  %214 = vmatprep.mubr.f32.mxu0 %v43_v4  ;;  %v55_v6 = vld [vmem:[#allocation5 + $0x50] sm:$0xff]  ;;  %v54_v7 = vld [vmem:[#allocation5 + $0x48] sm:$0xff]  ;;  %s262_s26 = scalar_lea.vmem %s151_s25, 256  ;;  %p267_p11 = scmp.lt.s32.totalorder %s151_s25, %s151_s25 }
  0x1f   :  { %184 = vmatprep.subr.mxu0 %v59_v1  ;;  %v53_v8 = vld [vmem:[#allocation5 + $0x40] sm:$0xff]  ;;  %v52_v9 = vld [vmem:[#allocation5 + $0x38] sm:$0xff]  ;;  %v51_v10 = vld [vmem:[#allocation5 + $0x30] sm:$0xff]  ;;  %p263_p10 = scmp.ne.s32.totalorder %s151_s25, %s262_s26  ;;  %p268_p12 = scmp.lt.s32.totalorder %s262_s26, %s262_s26 }
  0x20   :  { %185 = vmatpush3.msra.mxu0 %v59_v1  ;;  %v50_v11 = vld [vmem:[#allocation5 + $0x28] sm:$0xff]  ;;  %v49_v12 = vld [vmem:[#allocation5 + $0x20] sm:$0xff]  ;;  %v48_v13 = vld [vmem:[#allocation5 + $0x18] sm:$0xff] }
  0x21   :  { %186 = vmatprep.subr.mxu0 %v58_v2  ;;  %v47_v14 = vld [vmem:[#allocation5 + $0x10] sm:$0xff]  ;;  %v46_v15 = vld [vmem:[#allocation5 + $0x8] sm:$0xff]  ;;  %v45_v16 = vld [vmem:[#allocation5] sm:$0xff]  ;;  %p269_p13 = por %p268_p12, %p267_p11 }
  0x22   :  { %187 = vmatpush3.msra.mxu0 %v58_v2  ;;  %v44_v17 = vld [vmem:[#allocation2 + $0x8] sm:$0xff]  ;;  %v163_v18 = vld [vmem:[%s336_s2] ss:$0 sm:$0xff] }
  0x23   :  { %188 = vmatprep.subr.mxu0 %v57_v3  ;;  %p270_p0 = pnand %p269_p13, %p263_p10 }
  0x24   :  { %189 = vmatpush3.msra.mxu0 %v57_v3 }
  0x25   :  { %190 = vmatprep.subr.mxu0 %v56_v5 }
  0x26   :  { %191 = vmatpush3.msra.mxu0 %v56_v5 }
  0x27   :  { %192 = vmatprep.subr.mxu0 %v55_v6 }
  0x28   :  { %193 = vmatpush3.msra.mxu0 %v55_v6 }
  0x29   :  { %194 = vmatprep.subr.mxu0 %v54_v7 }
  0x2a   :  { %195 = vmatpush3.msra.mxu0 %v54_v7 }
  0x2b   :  { %196 = vmatprep.subr.mxu0 %v53_v8 }
  0x2c   :  { %197 = vmatpush3.msra.mxu0 %v53_v8 }
  0x2d   :  { %198 = vmatprep.subr.mxu0 %v52_v9 }
  0x2e   :  { %199 = vmatpush3.msra.mxu0 %v52_v9 }
  0x2f   :  { %200 = vmatprep.subr.mxu0 %v51_v10 }
  0x30   :  { %201 = vmatpush3.msra.mxu0 %v51_v10 }
  0x31   :  { %202 = vmatprep.subr.mxu0 %v50_v11 }
  0x32   :  { %203 = vmatpush3.msra.mxu0 %v50_v11 }
  0x33   :  { %204 = vmatprep.subr.mxu0 %v49_v12 }
  0x34   :  { %205 = vmatpush3.msra.mxu0 %v49_v12 }
  0x35   :  { %206 = vmatprep.subr.mxu0 %v48_v13 }
  0x36   :  { %207 = vmatpush3.msra.mxu0 %v48_v13 }
  0x37   :  { %208 = vmatprep.subr.mxu0 %v47_v14 }
  0x38   :  { %209 = vmatpush3.msra.mxu0 %v47_v14 }
  0x39   :  { %210 = vmatprep.subr.mxu0 %v46_v15 }
  0x3a   :  { %211 = vmatpush3.msra.mxu0 %v46_v15 }
  0x3b   :  { %212 = vmatprep.subr.mxu0 %v45_v16 }
  0x3c   :  { %213 = vmatpush3.msra.mxu0 %v45_v16 }
  0x3d   :  { %215 = vmatmul.mubr.f32.vlgmr.msra.gmra.mxu0 %v44_v17 }
  0xfd   :  { %v216_v19 = vpop.f32.mrf.mxu0 }
  0xfe   :  { %v140_v20 = vadd.f32 %v216_v19, %v163_v18 }
  0xff   :  { %v134_v21 = vpop.f32.mrf.mxu0 }
 0x100   :  { %144 = vst [vmem:[#allocation7 + $0x8] sm:$0xff] %v140_v20  ;;  %v135_v22 = vadd.f32 %v163_v18, %v134_v21 }
 0x102   :  { %143 = vst [vmem:[#allocation7] sm:$0xff] %v135_v22 }
 0x103   :  { %273 = shalt.err (!%p270_p0)
}
 0x104   :  { %156 = dma.vmem_to_hbm [thread:$0]  %s151_s25, 256, %s337_s3, [#allocation4], %s289_s15, %s289_s15, %s290_s16  }
 0x105   :  { %286 = dma.done.wait [#allocation4], 256  }
 0x106   :  { %287 = vsyncadd [#allocation4], 4294967040 }
 0x107   :  { %160 = vsyncpa [#allocation3], 1 }
 0x108   :  { %161 = vsyncpa [#allocation6], 1 }
 0x109   :  { %162 = vsyncpa [#allocation4], 1 }

</bundles_post_ra>
